<compile_context>
chip_gen: v7x
topology: tpu7x:2x2x1
jax: 0.10.0
libtpu: 0.0.40
codegen_flags: <defaults>
</compile_context>

<pallas_src>
import functools
import math

import jax
import jax.numpy as jnp
from jax.experimental import pallas as pl
from jax.experimental.pallas import tpu as pltpu


def _chip_tuning():
    """Return (target_block_bytes, vmem_limit_bytes_or_None, try_core_parallel)."""
    try:
        kind = jax.devices()[0].device_kind.lower()
    except Exception:
        kind = ""
    if "v7" in kind or "7x" in kind:
        # v7x: 2 TCs @ 3.2 TB/s each, 64 MiB physical VMEM.
        return 6 * 1024 * 1024, 40 * 1024 * 1024, True
    if "v6" in kind:
        # v6e: 1 TC, ~1.4 TB/s, 128 MiB physical VMEM.
        return 8 * 1024 * 1024, 64 * 1024 * 1024, False
    if "v5" in kind:
        # v5e/v5p: per-step overhead already small; modest blocks, but raise
        # the 16 MiB scoped-VMEM default so 4 x 4 MiB resident buffers fit.
        return 4 * 1024 * 1024, 32 * 1024 * 1024, False
    # Unknown / older generation: stay with the known-good conservative config.
    return 2 * 1024 * 1024, None, False


def _apply_act(x, hidden_act: str):
    """Elementwise activation matching the PyTorch module's mapping."""
    act = hidden_act.lower()
    # bf16 math stays in bf16 (VPU/EUP are bf16-native on v6e/v7x); other
    # narrow float types upcast to f32 for the gelu polynomial.
    native = x.dtype in (jnp.float32, jnp.float64, jnp.bfloat16)
    if act == "relu":
        return jnp.maximum(x, 0)
    elif act == "tanh":
        return jnp.tanh(x)
    elif act == "swish":
        return x * jax.nn.sigmoid(x)
    elif act == "gelu":
        # gelu_new: tanh approximation (Google BERT / OpenAI GPT).
        xf = x if native else x.astype(jnp.float32)
        c = math.sqrt(2.0 / math.pi)
        y = 0.5 * xf * (1.0 + jnp.tanh(c * (xf + 0.044715 * (xf * xf * xf))))
        return y.astype(x.dtype)
    elif act == "gelu_orig":
        # exact gelu: 0.5 * x * (1 + erf(x / sqrt(2))); keep f32 for erf.
        xf = x.astype(jnp.float32)
        y = 0.5 * xf * (1.0 + jax.lax.erf(xf * (1.0 / math.sqrt(2.0))))
        return y.astype(x.dtype)
    elif act == "leakyrelu":
        # torch default negative_slope = 0.01
        return jnp.where(x >= 0, x, x * 0.01)
    else:
        raise ValueError(f"unsupported activation: {hidden_act}")


def _activation_kernel(x_ref, o_ref, *, hidden_act: str):
    o_ref[...] = _apply_act(x_ref[...], hidden_act).astype(o_ref.dtype)


_FLOPS_PER_ELEM = {"relu": 1, "leakyrelu": 2, "tanh": 4, "swish": 5,
                   "gelu": 10, "gelu_orig": 8}
_TRANSC_PER_ELEM = {"relu": 0, "leakyrelu": 0, "tanh": 1, "swish": 1,
                    "gelu": 1, "gelu_orig": 1}


def _run_2d(x2d, hidden_act, *, target_block_bytes, vmem_limit, try_core_parallel):
    """Run the streaming activation kernel over a lane-dense (rows, lane) view."""
    rows, lane = x2d.shape
    dtype = x2d.dtype
    itemsize = jnp.dtype(dtype).itemsize

    # Packed-sublane multiple: 8 rows for 32-bit, 16 for 16-bit, 32 for 8-bit.
    sublane_mult = max(8, 32 // itemsize)
    row_tile = (target_block_bytes // (lane * itemsize)) // sublane_mult * sublane_mult
    row_tile = max(sublane_mult, row_tile)
    if row_tile >= rows:
        row_tile = rows  # full-extent block is always a legal block shape
        grid = (1,)
    else:
        grid = (pl.cdiv(rows, row_tile),)  # ragged last row-block is masked by Pallas

    act = hidden_act.lower()
    n = rows * lane
    cost = pl.CostEstimate(
        flops=_FLOPS_PER_ELEM[act] * n,
        transcendentals=_TRANSC_PER_ELEM[act] * n,
        bytes_accessed=2 * n * itemsize,
    )
    kernel = functools.partial(_activation_kernel, hidden_act=act)

    def call(dim_sems):
        return pl.pallas_call(
            kernel,
            out_shape=jax.ShapeDtypeStruct((rows, lane), dtype),
            grid_spec=pltpu.PrefetchScalarGridSpec(
                num_scalar_prefetch=0,
                grid=grid,
                in_specs=[pl.BlockSpec((row_tile, lane), lambda i: (i, 0))],
                out_specs=pl.BlockSpec((row_tile, lane), lambda i: (i, 0)),
            ),
            compiler_params=pltpu.CompilerParams(
                dimension_semantics=dim_sems,
                vmem_limit_bytes=vmem_limit,
            ),
            cost_estimate=cost,
        )(x2d)

    # On v7x ask for CORE_PARALLEL so the grid is actually split across the two
    # TensorCores; fall back to the known-good "parallel" if the target rejects
    # it.  (The wrapper is called eagerly here, so a failed lowering is
    # catchable.)
    candidates = ([(pltpu.CORE_PARALLEL,)] if try_core_parallel else []) + [("parallel",)]
    last_err = None
    for sems in candidates:
        try:
            return call(sems)
        except Exception as e:  # pragma: no cover - only hit on exotic targets
            last_err = e
    raise last_err


def activation_pallas(x, hidden_act: str, *, target_block_bytes=None):
    """Elementwise activation matching Activation_Function_Class(hidden_act)(x)."""
    orig_shape = x.shape
    n = x.size
    tuned_block, vmem_limit, try_cp = _chip_tuning()
    if target_block_bytes is None:
        target_block_bytes = tuned_block

    # Widest lane-dense last dim (1024/512/256/128) that divides n exactly.
    lane = next((c for c in (1024, 512, 256, 128) if n % c == 0), None)
    flat = x.reshape(-1)

    if lane is not None:
        out2d = _run_2d(flat.reshape(n // lane, lane), hidden_act,
                        target_block_bytes=target_block_bytes,
                        vmem_limit=vmem_limit, try_core_parallel=try_cp)
        return out2d.reshape(orig_shape)

    # Ragged element count: run the 128-divisible bulk through the kernel and
    # handle the <128-element tail with plain jnp (no whole-array pad + slice).
    lane = 128
    rows = n // lane
    if rows == 0:
        # Fewer than 128 elements: a kernel launch is pure overhead.
        return _apply_act(x, hidden_act)
    bulk = rows * lane
    out_bulk = _run_2d(flat[:bulk].reshape(rows, lane), hidden_act,
                       target_block_bytes=target_block_bytes,
                       vmem_limit=vmem_limit, try_core_parallel=try_cp)
    out_tail = _apply_act(flat[bulk:], hidden_act)
    return jnp.concatenate([out_bulk.reshape(-1), out_tail]).reshape(orig_shape)


def _reference(x, hidden_act: str):
    return _apply_act(x, hidden_act)


if __name__ == "__main__":
    key = jax.random.PRNGKey(0)
    k1, k2, k3 = jax.random.split(key, 3)
    # NCHW-style input (batch=2, channels=4, spatial=16x16) -- lane-divisible.
    x_main = jax.random.normal(k1, (2, 4, 16, 16), dtype=jnp.float32)
    # Ragged element count exercising the bulk + jnp-tail path.
    x_ragged = jax.random.normal(k2, (3, 5, 7, 11), dtype=jnp.float32)
    # Multi-block case (small block override) exercising the masked boundary
    # block of the row grid: 40 rows of 1024 with a 16-row tile -> grid of 3.
    x_grid = jax.random.normal(k3, (2, 20, 1024), dtype=jnp.float32)

    ok = True
    for act in ["relu", "tanh", "swish", "gelu", "gelu_orig", "leakyrelu"]:
        for x, blk in ((x_main, None), (x_ragged, None), (x_grid, 64 * 1024)):
            out = jax.block_until_ready(
                activation_pallas(x, act, target_block_bytes=blk))
            ref = _reference(x, act)
            if out.shape != x.shape or not jnp.allclose(out, ref, atol=1e-5, rtol=1e-5):
                ok = False
                print(f"MISMATCH for activation {act} at shape {x.shape}")

    if ok:
        print("KERNEL_OK")
</pallas_src>

<mosaic_0001>
module attributes {stable_mosaic.version = 11 : i64} {
  func.func @_activation_kernel(%arg0: i32, %arg1: memref<2x1024xf32, #tpu.memory_space<vmem>>, %arg2: memref<2x1024xf32, #tpu.memory_space<vmem>>) attributes {dimension_semantics = [#tpu.dimension_semantics<parallel>], iteration_bounds = array<i64: 1>, scalar_prefetch = 0 : i64, scratch_operands = 0 : i64, tpu.core_type = #tpu.core_type<tc>, window_params = [{transform_indices = @transform_0, window_bounds = array<i64: 2, 1024>}, {transform_indices = @transform_1, window_bounds = array<i64: 2, 1024>}]} {
    %c0 = arith.constant 0 : index
    %c0_0 = arith.constant 0 : index
    %0 = vector.load %arg1[%c0, %c0_0] : memref<2x1024xf32, #tpu.memory_space<vmem>>, vector<2x1024xf32>
    %cst = arith.constant 0.000000e+00 : f32
    %1 = vector.broadcast %cst : f32 to vector<2x1024xf32>
    %2 = arith.maximumf %0, %1 : vector<2x1024xf32>
    %c0_1 = arith.constant 0 : index
    %c0_2 = arith.constant 0 : index
    %3 = vector.load %arg2[%c0_1, %c0_2] : memref<2x1024xf32, #tpu.memory_space<vmem>>, vector<2x1024xf32>
    tpu.vector_store %arg2[%c0_1, %c0_2], %2 {strides = array<i32>} : memref<2x1024xf32, #tpu.memory_space<vmem>>, vector<2x1024xf32>,
    return
  }
  func.func @transform_0(%arg0: i32) -> (i32, i32) {
    %c0_i32 = arith.constant 0 : i32
    %c0_i32_0 = arith.constant 0 : i32
    return %arg0, %c0_i32 : i32, i32
  }
  func.func @transform_1(%arg0: i32) -> (i32, i32) {
    %c0_i32 = arith.constant 0 : i32
    %c0_i32_0 = arith.constant 0 : i32
    return %arg0, %c0_i32 : i32, i32
  }
}

</mosaic_0001>

<bundles_post_ra>
// kernel: tpu_custom_call.1
= control target key start
LH: loop header
LB: loop body
LE: loop exit
PB: predicated region body
PF: predicated region fallthrough
CT: control target
= control target key end

     0   :  { %6 = vsyncpa [#allocation3], 0  ;;  %s128_s0 = inlined_call_operand.hbm [shape: f32[2,1024], index: 0, kind: input, shape index: {}]   ;;  %s129_s1 = inlined_call_operand.hbm [shape: f32[2,1024], index: 1, kind: output, shape index: {}]  }
   0x1   :  { %7 = vsyncpa [#allocation4], 0  ;;  %s92_s6 = smov [#allocation2]   ;;  %s44_s10 = scalar_lea.hbm %s128_s0, 256 }
   0x2   :  { %s14_s7 = sshll.u32 %s92_s6, 4  ;;  %p45_p0 = scmp.ne.s32.totalorder %s128_s0, %s44_s10  ;;  %s15_s7 = int_to_ptr.vmem [resolvable:$true] %s14_s7 }
   0x3   :  { %p48_p1 = scmp.lt.u32.totalorder %s44_s10, %s128_s0 }
   0x5   :  { %p50_p2 = pnand %p48_p1, %p45_p0 }
   0x7   :  { %53 = shalt.err (!%p50_p2)
}
   0x8   :  { %s54_s15 = scalar_lea.vmem %s15_s7, 256  ;;  %p59_p4 = scmp.lt.s32.totalorder %s15_s7, %s15_s7 }
   0x9   :  { %p55_p3 = scmp.ne.s32.totalorder %s15_s7, %s54_s15  ;;  %p60_p5 = scmp.lt.s32.totalorder %s54_s15, %s54_s15 }
   0xb   :  { %p61_p6 = por %p60_p5, %p59_p4 }
   0xd   :  { %p62_p7 = pnand %p61_p6, %p55_p3 }
   0xf   :  { %65 = shalt.err (!%p62_p7)
}
  0x10   :  { %17 = dma.hbm_to_vmem [thread:$0]  %s128_s0, 256, %s15_s7, [#allocation3]  }
  0x11   :  { %88 = dma.done.wait [#allocation3], 256  }
  0x12   :  { %89 = vsyncadd [#allocation3], 4294967040  ;;  %s93_s18 = smov [#allocation5]   ;;  %v21_v0 = vld [vmem:[#allocation2] sm:$0xff]  ;;  %v22_v1 = vld [vmem:[#allocation2 + $0x8] sm:$0xff] }
  0x13   :  { %s33_s19 = sshll.u32 %s93_s18, 4  ;;  %v23_v2 = vmax.f32 %v21_v0, 0.0  ;;  %v24_v3 = vmax.f32 %v22_v1, 0.0  ;;  %s34_s19 = int_to_ptr.vmem [resolvable:$true] %s33_s19 }
  0x14   :  { %s66_s20 = scalar_lea.vmem %s34_s19, 256  ;;  %p71_p9 = scmp.lt.s32.totalorder %s34_s19, %s34_s19 }
  0x15   :  { %25 = vst [vmem:[#allocation5] sm:$0xff] %v23_v2  ;;  %26 = vst [vmem:[#allocation5 + $0x8] sm:$0xff] %v24_v3  ;;  %p67_p8 = scmp.ne.s32.totalorder %s34_s19, %s66_s20  ;;  %p72_p10 = scmp.lt.s32.totalorder %s66_s20, %s66_s20 }
  0x17   :  { %p73_p11 = por %p72_p10, %p71_p9 }
  0x19   :  { %p74_p12 = pnand %p73_p11, %p67_p8 }
  0x1b   :  { %77 = shalt.err (!%p74_p12)
}
  0x1c   :  { %s78_s22 = scalar_lea.hbm %s129_s1, 256 }
  0x1d   :  { %p79_p13 = scmp.ne.s32.totalorder %s129_s1, %s78_s22  ;;  %p82_p0 = scmp.lt.u32.totalorder %s78_s22, %s129_s1 }
  0x1f   :  { %p84_p1 = pnand %p82_p0, %p79_p13 }
  0x21   :  { %87 = shalt.err (!%p84_p1)
}
  0x22   :  { %36 = dma.vmem_to_hbm [thread:$0]  %s34_s19, 256, %s129_s1, [#allocation4]  }
  0x23   :  { %90 = dma.done.wait [#allocation4], 256  }
  0x24   :  { %91 = vsyncadd [#allocation4], 4294967040 }
  0x25   :  { %40 = vsyncpa [#allocation3], 1 }
  0x26   :  { %41 = vsyncpa [#allocation4], 1 }

</bundles_post_ra>
